<compile_context>
chip_gen: v5e
topology: v5e:2x2
jax: 0.10.0
libtpu: 0.0.40
codegen_flags: <defaults>
</compile_context>

<pallas_src>
import jax
import jax.numpy as jnp
from jax.experimental import pallas as pl
from jax.experimental.pallas import tpu as pltpu


def _round_up(n, m):
    return ((n + m - 1) // m) * m


def linear_vae_fwd_kernel(scale_ref,
                          x_ref, w1t_ref, w2t_ref, u2t_ref, u1t_ref,
                          e1_ref, e2_ref, ey_ref,
                          y_ref, mu_z1e_ref, z1e_ref, mu_z2e_ref,
                          mu_z1d_ref, mu_y_ref):
    sigma_1 = scale_ref[0]
    sigma_2 = scale_ref[1]
    eta_dec = scale_ref[2]

    mm_dtype = w1t_ref.dtype  # matmul input dtype (bf16 by default)

    # encoder_z1: mu_z1_enc = (W_1 @ x.T).T == x @ W_1.T ; weight arrives pre-transposed.
    mu_z1_enc = jnp.dot(x_ref[...], w1t_ref[...],
                        preferred_element_type=jnp.float32)
    # reparameterize with diag(Sigma_1) = sigma_1 * ones(d_1)   (f32 elementwise)
    z1 = mu_z1_enc + sigma_1 * e1_ref[...]
    z1_mm = z1.astype(mm_dtype)

    # encoder_z2: mu_z2_enc = z1 @ W_2.T
    mu_z2_enc = jnp.dot(z1_mm, w2t_ref[...],
                        preferred_element_type=jnp.float32)
    z2 = mu_z2_enc + sigma_2 * e2_ref[...]

    # decoder_z1: mu_z1_dec = z2 @ U_2.T
    # (z1_parameterized_dec is computed in torch but not returned by forward)
    mu_z1_dec = jnp.dot(z2.astype(mm_dtype), u2t_ref[...],
                        preferred_element_type=jnp.float32)

    # decoder_y: mu_y = z1 @ U_1.T
    mu_y = jnp.dot(z1_mm, u1t_ref[...],
                   preferred_element_type=jnp.float32)
    y = mu_y + eta_dec * ey_ref[...]

    y_ref[...] = y
    mu_z1e_ref[...] = mu_z1_enc
    z1e_ref[...] = z1
    mu_z2e_ref[...] = mu_z2_enc
    mu_z1d_ref[...] = mu_z1_dec
    mu_y_ref[...] = mu_y


def linear_vae_forward(x, params, noise, *, sigma_1, sigma_2, eta_dec,
                       matmul_dtype=jnp.bfloat16, batch_tile=512):
    """Runs the LinearVAE forward pass as one Pallas call.

    Returns (y_parameterized, mu_z1_enc, z1_parameterized_enc,
             mu_z2_enc, mu_z1_dec, mu_y), matching torch forward().
    """
    W_1, W_2, U_2, U_1 = params["W_1"], params["W_2"], params["U_2"], params["U_1"]

    B, d_0 = x.shape
    d_1 = W_1.shape[0]
    d_2 = W_2.shape[0]

    # Lane-dense padding: features -> multiples of 128, batch -> multiple of the tile.
    d0p = _round_up(d_0, 128)
    d1p = _round_up(d_1, 128)
    d2p = _round_up(d_2, 128)
    tm = min(batch_tile, _round_up(B, 8))
    Bp = _round_up(B, tm)

    def pad2(a, rows, cols, dtype):
        a = a.astype(dtype)
        return jnp.pad(a, ((0, rows - a.shape[0]), (0, cols - a.shape[1])))

    # Pre-transposed (in, out) weight layout; zero padding keeps the math exact.
    w1t = pad2(W_1.T, d0p, d1p, matmul_dtype)
    w2t = pad2(W_2.T, d1p, d2p, matmul_dtype)
    u2t = pad2(U_2.T, d2p, d1p, matmul_dtype)
    u1t = pad2(U_1.T, d1p, d0p, matmul_dtype)

    xp = pad2(x, Bp, d0p, matmul_dtype)
    e1 = pad2(noise["eps_z1"], Bp, d1p, jnp.float32)
    e2 = pad2(noise["eps_z2"], Bp, d2p, jnp.float32)
    ey = pad2(noise["eps_y"], Bp, d0p, jnp.float32)

    # Runtime scalars in SMEM -> no recompile when sigma/eta are swept.
    scales = jnp.array([sigma_1, sigma_2, eta_dec], dtype=jnp.float32)

    def row_spec(d):
        return pl.BlockSpec((tm, d), lambda i: (i, 0))

    def weight_spec(r, c):
        # Same block index for every grid step -> weights stay VMEM-resident.
        return pl.BlockSpec((r, c), lambda i: (0, 0))

    out_shapes = (
        jax.ShapeDtypeStruct((Bp, d0p), jnp.float32),  # y_parameterized
        jax.ShapeDtypeStruct((Bp, d1p), jnp.float32),  # mu_z1_enc
        jax.ShapeDtypeStruct((Bp, d1p), jnp.float32),  # z1_parameterized_enc
        jax.ShapeDtypeStruct((Bp, d2p), jnp.float32),  # mu_z2_enc
        jax.ShapeDtypeStruct((Bp, d1p), jnp.float32),  # mu_z1_dec
        jax.ShapeDtypeStruct((Bp, d0p), jnp.float32),  # mu_y
    )

    outs = pl.pallas_call(
        linear_vae_fwd_kernel,
        grid=(Bp // tm,),
        in_specs=[
            pl.BlockSpec(memory_space=pltpu.MemorySpace.SMEM),  # scales
            row_spec(d0p),                                      # x
            weight_spec(d0p, d1p),                              # W_1.T
            weight_spec(d1p, d2p),                              # W_2.T
            weight_spec(d2p, d1p),                              # U_2.T
            weight_spec(d1p, d0p),                              # U_1.T
            row_spec(d1p),                                      # eps_z1
            row_spec(d2p),                                      # eps_z2
            row_spec(d0p),                                      # eps_y
        ],
        out_specs=(row_spec(d0p), row_spec(d1p), row_spec(d1p),
                   row_spec(d2p), row_spec(d1p), row_spec(d0p)),
        out_shape=out_shapes,
        compiler_params=pltpu.CompilerParams(
            dimension_semantics=("parallel",),
        ),
    )(scales, xp, w1t, w2t, u2t, u1t, e1, e2, ey)

    y, mu_z1_enc, z1, mu_z2_enc, mu_z1_dec, mu_y = outs
    return (y[:B, :d_0], mu_z1_enc[:B, :d_1], z1[:B, :d_1],
            mu_z2_enc[:B, :d_2], mu_z1_dec[:B, :d_1], mu_y[:B, :d_0])


def reference_forward(x, params, noise, *, sigma_1, sigma_2, eta_dec,
                      matmul_dtype=jnp.float32):
    """Plain-JAX reference mirroring the torch module.

    matmul_dtype lets us reproduce the kernel's bf16-matmul / f32-accumulate
    numerics exactly; matmul_dtype=float32 is the bit-for-bit torch analogue.
    """
    W_1, W_2, U_2, U_1 = params["W_1"], params["W_2"], params["U_2"], params["U_1"]

    def mm(a, w):
        return jnp.dot(a.astype(matmul_dtype), w.T.astype(matmul_dtype),
                       preferred_element_type=jnp.float32)

    mu_z1_enc = mm(x, W_1)
    z1 = mu_z1_enc + sigma_1 * noise["eps_z1"]
    mu_z2_enc = mm(z1, W_2)
    z2 = mu_z2_enc + sigma_2 * noise["eps_z2"]
    mu_z1_dec = mm(z2, U_2)
    mu_y = mm(z1, U_1)
    y = mu_y + eta_dec * noise["eps_y"]
    return y, mu_z1_enc, z1, mu_z2_enc, mu_z1_dec, mu_y


if __name__ == "__main__":
    # Small, deterministic configuration.
    B, d_0, d_1, d_2 = 8, 64, 32, 16
    sigma_1, sigma_2 = 0.5, 0.25
    eta_dec, eta_enc = 0.1, 0.2  # eta_enc only appears in the loss, not forward

    key = jax.random.PRNGKey(0)
    k_x, k_w1, k_u1, k_w2, k_u2, k_e1, k_e2, k_ey = jax.random.split(key, 8)

    # Parameters: N(0, 0.1) as in the torch __init__ (std=0.1).
    params = {
        "W_1": 0.1 * jax.random.normal(k_w1, (d_1, d_0), jnp.float32),
        "U_1": 0.1 * jax.random.normal(k_u1, (d_0, d_1), jnp.float32),
        "W_2": 0.1 * jax.random.normal(k_w2, (d_2, d_1), jnp.float32),
        "U_2": 0.1 * jax.random.normal(k_u2, (d_1, d_2), jnp.float32),
    }

    x = jax.random.normal(k_x, (B, d_0), jnp.float32)

    # Deterministic stand-ins for torch.randn_like draws.
    noise = {
        "eps_z1": jax.random.normal(k_e1, (B, d_1), jnp.float32),
        "eps_z2": jax.random.normal(k_e2, (B, d_2), jnp.float32),
        "eps_y": jax.random.normal(k_ey, (B, d_0), jnp.float32),
    }

    outs = linear_vae_forward(x, params, noise,
                              sigma_1=sigma_1, sigma_2=sigma_2, eta_dec=eta_dec,
                              matmul_dtype=jnp.bfloat16)
    outs = jax.block_until_ready(outs)

    # Strict check against a reference using the same bf16-matmul / f32-accumulate numerics.
    refs_bf16 = reference_forward(x, params, noise,
                                  sigma_1=sigma_1, sigma_2=sigma_2,
                                  eta_dec=eta_dec, matmul_dtype=jnp.bfloat16)
    # Looser check against the exact-f32 torch-mirroring reference (bf16 weight quantization).
    refs_f32 = reference_forward(x, params, noise,
                                 sigma_1=sigma_1, sigma_2=sigma_2,
                                 eta_dec=eta_dec, matmul_dtype=jnp.float32)

    for o, r in zip(outs, refs_bf16):
        assert o.shape == r.shape and o.dtype == r.dtype
        assert jnp.allclose(o, r, atol=1e-4, rtol=1e-4)
    for o, r in zip(outs, refs_f32):
        assert jnp.allclose(o, r, atol=5e-2, rtol=5e-2)

    print("KERNEL_OK")
</pallas_src>

<mosaic_0001>
module attributes {stable_mosaic.version = 11 : i64} {
  func.func @linear_vae_fwd_kernel(%arg0: i32, %arg1: memref<3xf32, #tpu.memory_space<smem>>, %arg2: memref<8x128xbf16, #tpu.memory_space<vmem>>, %arg3: memref<128x128xbf16, #tpu.memory_space<vmem>>, %arg4: memref<128x128xbf16, #tpu.memory_space<vmem>>, %arg5: memref<128x128xbf16, #tpu.memory_space<vmem>>, %arg6: memref<128x128xbf16, #tpu.memory_space<vmem>>, %arg7: memref<8x128xf32, #tpu.memory_space<vmem>>, %arg8: memref<8x128xf32, #tpu.memory_space<vmem>>, %arg9: memref<8x128xf32, #tpu.memory_space<vmem>>, %arg10: memref<8x128xf32, #tpu.memory_space<vmem>>, %arg11: memref<8x128xf32, #tpu.memory_space<vmem>>, %arg12: memref<8x128xf32, #tpu.memory_space<vmem>>, %arg13: memref<8x128xf32, #tpu.memory_space<vmem>>, %arg14: memref<8x128xf32, #tpu.memory_space<vmem>>, %arg15: memref<8x128xf32, #tpu.memory_space<vmem>>) attributes {dimension_semantics = [#tpu.dimension_semantics<parallel>], iteration_bounds = array<i64: 1>, scalar_prefetch = 0 : i64, scratch_operands = 0 : i64, tpu.core_type = #tpu.core_type<tc>, window_params = [{transform_indices = @transform_0, window_bounds = array<i64: 3>}, {transform_indices = @transform_1, window_bounds = array<i64: 8, 128>}, {pipeline_mode = #tpu.pipeline_mode<synchronous>, transform_indices = @transform_2, window_bounds = array<i64: 128, 128>}, {pipeline_mode = #tpu.pipeline_mode<synchronous>, transform_indices = @transform_3, window_bounds = array<i64: 128, 128>}, {pipeline_mode = #tpu.pipeline_mode<synchronous>, transform_indices = @transform_4, window_bounds = array<i64: 128, 128>}, {pipeline_mode = #tpu.pipeline_mode<synchronous>, transform_indices = @transform_5, window_bounds = array<i64: 128, 128>}, {transform_indices = @transform_6, window_bounds = array<i64: 8, 128>}, {transform_indices = @transform_7, window_bounds = array<i64: 8, 128>}, {transform_indices = @transform_8, window_bounds = array<i64: 8, 128>}, {transform_indices = @transform_9, window_bounds = array<i64: 8, 128>}, {transform_indices = @transform_10, window_bounds = array<i64: 8, 128>}, {transform_indices = @transform_11, window_bounds = array<i64: 8, 128>}, {transform_indices = @transform_12, window_bounds = array<i64: 8, 128>}, {transform_indices = @transform_13, window_bounds = array<i64: 8, 128>}, {transform_indices = @transform_14, window_bounds = array<i64: 8, 128>}]} {
    %c0 = arith.constant 0 : index
    %0 = memref.load %arg1[%c0] : memref<3xf32, #tpu.memory_space<smem>>
    %c1 = arith.constant 1 : index
    %1 = memref.load %arg1[%c1] : memref<3xf32, #tpu.memory_space<smem>>
    %c2 = arith.constant 2 : index
    %2 = memref.load %arg1[%c2] : memref<3xf32, #tpu.memory_space<smem>>
    %c0_0 = arith.constant 0 : index
    %c0_1 = arith.constant 0 : index
    %3 = vector.load %arg2[%c0_0, %c0_1] : memref<8x128xbf16, #tpu.memory_space<vmem>>, vector<8x128xbf16>
    %c0_2 = arith.constant 0 : index
    %c0_3 = arith.constant 0 : index
    %4 = vector.load %arg3[%c0_2, %c0_3] : memref<128x128xbf16, #tpu.memory_space<vmem>>, vector<128x128xbf16>
    %cst = arith.constant dense<0.000000e+00> : vector<8x128xf32>
    %5 = tpu.matmul %3, %4, %cst {dimension_numbers = #tpu.dot_dimension_numbers<[1], [0], [0], [1], [0, 0, 1, 1], [], []>} : vector<8x128xbf16>, vector<128x128xbf16>, vector<8x128xf32> -> vector<8x128xf32>
    %c0_4 = arith.constant 0 : index
    %c0_5 = arith.constant 0 : index
    %6 = vector.load %arg7[%c0_4, %c0_5] : memref<8x128xf32, #tpu.memory_space<vmem>>, vector<8x128xf32>
    %7 = vector.broadcast %0 : f32 to vector<8x128xf32>
    %8 = arith.mulf %7, %6 : vector<8x128xf32>
    %9 = arith.addf %5, %8 : vector<8x128xf32>
    %10 = arith.truncf %9 : vector<8x128xf32> to vector<8x128xbf16>
    %c0_6 = arith.constant 0 : index
    %c0_7 = arith.constant 0 : index
    %11 = vector.load %arg4[%c0_6, %c0_7] : memref<128x128xbf16, #tpu.memory_space<vmem>>, vector<128x128xbf16>
    %cst_8 = arith.constant dense<0.000000e+00> : vector<8x128xf32>
    %12 = tpu.matmul %10, %11, %cst_8 {dimension_numbers = #tpu.dot_dimension_numbers<[1], [0], [0], [1], [0, 0, 1, 1], [], []>} : vector<8x128xbf16>, vector<128x128xbf16>, vector<8x128xf32> -> vector<8x128xf32>
    %c0_9 = arith.constant 0 : index
    %c0_10 = arith.constant 0 : index
    %13 = vector.load %arg8[%c0_9, %c0_10] : memref<8x128xf32, #tpu.memory_space<vmem>>, vector<8x128xf32>
    %14 = vector.broadcast %1 : f32 to vector<8x128xf32>
    %15 = arith.mulf %14, %13 : vector<8x128xf32>
    %16 = arith.addf %12, %15 : vector<8x128xf32>
    %17 = arith.truncf %16 : vector<8x128xf32> to vector<8x128xbf16>
    %c0_11 = arith.constant 0 : index
    %c0_12 = arith.constant 0 : index
    %18 = vector.load %arg5[%c0_11, %c0_12] : memref<128x128xbf16, #tpu.memory_space<vmem>>, vector<128x128xbf16>
    %cst_13 = arith.constant dense<0.000000e+00> : vector<8x128xf32>
    %19 = tpu.matmul %17, %18, %cst_13 {dimension_numbers = #tpu.dot_dimension_numbers<[1], [0], [0], [1], [0, 0, 1, 1], [], []>} : vector<8x128xbf16>, vector<128x128xbf16>, vector<8x128xf32> -> vector<8x128xf32>
    %c0_14 = arith.constant 0 : index
    %c0_15 = arith.constant 0 : index
    %20 = vector.load %arg6[%c0_14, %c0_15] : memref<128x128xbf16, #tpu.memory_space<vmem>>, vector<128x128xbf16>
    %cst_16 = arith.constant dense<0.000000e+00> : vector<8x128xf32>
    %21 = tpu.matmul %10, %20, %cst_16 {dimension_numbers = #tpu.dot_dimension_numbers<[1], [0], [0], [1], [0, 0, 1, 1], [], []>} : vector<8x128xbf16>, vector<128x128xbf16>, vector<8x128xf32> -> vector<8x128xf32>
    %c0_17 = arith.constant 0 : index
    %c0_18 = arith.constant 0 : index
    %22 = vector.load %arg9[%c0_17, %c0_18] : memref<8x128xf32, #tpu.memory_space<vmem>>, vector<8x128xf32>
    %23 = vector.broadcast %2 : f32 to vector<8x128xf32>
    %24 = arith.mulf %23, %22 : vector<8x128xf32>
    %25 = arith.addf %21, %24 : vector<8x128xf32>
    %c0_19 = arith.constant 0 : index
    %c0_20 = arith.constant 0 : index
    %26 = vector.load %arg10[%c0_19, %c0_20] : memref<8x128xf32, #tpu.memory_space<vmem>>, vector<8x128xf32>
    tpu.vector_store %arg10[%c0_19, %c0_20], %25 {strides = array<i32>} : memref<8x128xf32, #tpu.memory_space<vmem>>, vector<8x128xf32>,
    %c0_21 = arith.constant 0 : index
    %c0_22 = arith.constant 0 : index
    %27 = vector.load %arg11[%c0_21, %c0_22] : memref<8x128xf32, #tpu.memory_space<vmem>>, vector<8x128xf32>
    tpu.vector_store %arg11[%c0_21, %c0_22], %5 {strides = array<i32>} : memref<8x128xf32, #tpu.memory_space<vmem>>, vector<8x128xf32>,
    %c0_23 = arith.constant 0 : index
    %c0_24 = arith.constant 0 : index
    %28 = vector.load %arg12[%c0_23, %c0_24] : memref<8x128xf32, #tpu.memory_space<vmem>>, vector<8x128xf32>
    tpu.vector_store %arg12[%c0_23, %c0_24], %9 {strides = array<i32>} : memref<8x128xf32, #tpu.memory_space<vmem>>, vector<8x128xf32>,
    %c0_25 = arith.constant 0 : index
    %c0_26 = arith.constant 0 : index
    %29 = vector.load %arg13[%c0_25, %c0_26] : memref<8x128xf32, #tpu.memory_space<vmem>>, vector<8x128xf32>
    tpu.vector_store %arg13[%c0_25, %c0_26], %12 {strides = array<i32>} : memref<8x128xf32, #tpu.memory_space<vmem>>, vector<8x128xf32>,
    %c0_27 = arith.constant 0 : index
    %c0_28 = arith.constant 0 : index
    %30 = vector.load %arg14[%c0_27, %c0_28] : memref<8x128xf32, #tpu.memory_space<vmem>>, vector<8x128xf32>
    tpu.vector_store %arg14[%c0_27, %c0_28], %19 {strides = array<i32>} : memref<8x128xf32, #tpu.memory_space<vmem>>, vector<8x128xf32>,
    %c0_29 = arith.constant 0 : index
    %c0_30 = arith.constant 0 : index
    %31 = vector.load %arg15[%c0_29, %c0_30] : memref<8x128xf32, #tpu.memory_space<vmem>>, vector<8x128xf32>
    tpu.vector_store %arg15[%c0_29, %c0_30], %21 {strides = array<i32>} : memref<8x128xf32, #tpu.memory_space<vmem>>, vector<8x128xf32>,
    return
  }
  func.func @transform_0(%arg0: i32) -> i32 {
    %c0_i32 = arith.constant 0 : i32
    %c0_i32_0 = arith.constant 0 : i32
    return %c0_i32 : i32
  }
  func.func @transform_1(%arg0: i32) -> (i32, i32) {
    %c0_i32 = arith.constant 0 : i32
    %c0_i32_0 = arith.constant 0 : i32
    return %arg0, %c0_i32 : i32, i32
  }
  func.func @transform_2(%arg0: i32) -> (i32, i32) {
    %c0_i32 = arith.constant 0 : i32
    %c0_i32_0 = arith.constant 0 : i32
    %c0_i32_1 = arith.constant 0 : i32
    return %c0_i32, %c0_i32_0 : i32, i32
  }
  func.func @transform_3(%arg0: i32) -> (i32, i32) {
    %c0_i32 = arith.constant 0 : i32
    %c0_i32_0 = arith.constant 0 : i32
    %c0_i32_1 = arith.constant 0 : i32
    return %c0_i32, %c0_i32_0 : i32, i32
  }
  func.func @transform_4(%arg0: i32) -> (i32, i32) {
    %c0_i32 = arith.constant 0 : i32
    %c0_i32_0 = arith.constant 0 : i32
    %c0_i32_1 = arith.constant 0 : i32
    return %c0_i32, %c0_i32_0 : i32, i32
  }
  func.func @transform_5(%arg0: i32) -> (i32, i32) {
    %c0_i32 = arith.constant 0 : i32
    %c0_i32_0 = arith.constant 0 : i32
    %c0_i32_1 = arith.constant 0 : i32
    return %c0_i32, %c0_i32_0 : i32, i32
  }
  func.func @transform_6(%arg0: i32) -> (i32, i32) {
    %c0_i32 = arith.constant 0 : i32
    %c0_i32_0 = arith.constant 0 : i32
    return %arg0, %c0_i32 : i32, i32
  }
  func.func @transform_7(%arg0: i32) -> (i32, i32) {
    %c0_i32 = arith.constant 0 : i32
    %c0_i32_0 = arith.constant 0 : i32
    return %arg0, %c0_i32 : i32, i32
  }
  func.func @transform_8(%arg0: i32) -> (i32, i32) {
    %c0_i32 = arith.constant 0 : i32
    %c0_i32_0 = arith.constant 0 : i32
    return %arg0, %c0_i32 : i32, i32
  }
  func.func @transform_9(%arg0: i32) -> (i32, i32) {
    %c0_i32 = arith.constant 0 : i32
    %c0_i32_0 = arith.constant 0 : i32
    return %arg0, %c0_i32 : i32, i32
  }
  func.func @transform_10(%arg0: i32) -> (i32, i32) {
    %c0_i32 = arith.constant 0 : i32
    %c0_i32_0 = arith.constant 0 : i32
    return %arg0, %c0_i32 : i32, i32
  }
  func.func @transform_11(%arg0: i32) -> (i32, i32) {
    %c0_i32 = arith.constant 0 : i32
    %c0_i32_0 = arith.constant 0 : i32
    return %arg0, %c0_i32 : i32, i32
  }
  func.func @transform_12(%arg0: i32) -> (i32, i32) {
    %c0_i32 = arith.constant 0 : i32
    %c0_i32_0 = arith.constant 0 : i32
    return %arg0, %c0_i32 : i32, i32
  }
  func.func @transform_13(%arg0: i32) -> (i32, i32) {
    %c0_i32 = arith.constant 0 : i32
    %c0_i32_0 = arith.constant 0 : i32
    return %arg0, %c0_i32 : i32, i32
  }
  func.func @transform_14(%arg0: i32) -> (i32, i32) {
    %c0_i32 = arith.constant 0 : i32
    %c0_i32_0 = arith.constant 0 : i32
    return %arg0, %c0_i32 : i32, i32
  }
}

</mosaic_0001>

<bundles_post_ra>
// kernel: tpu_custom_call.1
= control target key start
LH: loop header
LB: loop body
LE: loop exit
PB: predicated region body
PF: predicated region fallthrough
CT: control target
= control target key end

     0   :  { %20 = vsyncpa [#allocation5], 0  ;;  %s1300_s0 = inlined_call_operand.hbm [shape: f32[3], index: 0, kind: input, shape index: {}]   ;;  %s1301_s1 = inlined_call_operand.hbm [shape: bf16[8,128], index: 1, kind: input, shape index: {}]   ;;  %s1302_s2 = inlined_call_operand.hbm [shape: bf16[128,128], index: 2, kind: input, shape index: {}]   ;;  %s1303_s3 = inlined_call_operand.hbm [shape: bf16[128,128], index: 3, kind: input, shape index: {}]   ;;  %s1304_s4 = inlined_call_operand.hbm [shape: bf16[128,128], index: 4, kind: input, shape index: {}]   ;;  %s1305_s5 = inlined_call_operand.hbm [shape: bf16[128,128], index: 5, kind: input, shape index: {}]   ;;  %s1306_s6 = inlined_call_operand.hbm [shape: f32[8,128], index: 6, kind: input, shape index: {}]   ;;  %s1307_s7 = inlined_call_operand.hbm [shape: f32[8,128], index: 7, kind: input, shape index: {}]   ;;  %s1308_s8 = inlined_call_operand.hbm [shape: f32[8,128], index: 8, kind: input, shape index: {}]   ;;  %s1309_s9 = inlined_call_operand.hbm [shape: f32[8,128], index: 9, kind: output, shape index: {0}]   ;;  %s1310_s10 = inlined_call_operand.hbm [shape: f32[8,128], index: 10, kind: output, shape index: {1}]   ;;  %s1311_s11 = inlined_call_operand.hbm [shape: f32[8,128], index: 11, kind: output, shape index: {2}]   ;;  %s1312_s12 = inlined_call_operand.hbm [shape: f32[8,128], index: 12, kind: output, shape index: {3}]   ;;  %s1313_s13 = inlined_call_operand.hbm [shape: f32[8,128], index: 13, kind: output, shape index: {4}]   ;;  %s1314_s14 = inlined_call_operand.hbm [shape: f32[8,128], index: 14, kind: output, shape index: {5}]  }
   0x1   :  { %21 = vsyncpa [#allocation3], 0 }
   0x2   :  { %22 = vsyncpa [#allocation8], 0 }
   0x3   :  { %23 = vsyncpa [#allocation11], 0 }
   0x4   :  { %24 = vsyncpa [#allocation14], 0 }
   0x5   :  { %25 = vsyncpa [#allocation17], 0 }
   0x6   :  { %26 = vsyncpa [#allocation4], 0 }
   0x7   :  { %27 = vsyncpa [#allocation20], 0 }
   0x8   :  { %28 = vsyncpa [#allocation23], 0  ;;  %s54_s15 = sshll.u32 %s1302_s2, 4  ;;  %s55_s15 = int_to_ptr.hbm [resolvable:$true] %s54_s15 }
   0x9   :  { %29 = vsyncpa [#allocation26], 0  ;;  %s1151_s16 = smov [#allocation7]   ;;  %s80_s20 = sshll.u32 %s1304_s4, 4  ;;  %s81_s20 = int_to_ptr.hbm [resolvable:$true] %s80_s20 }
   0xa   :  { %s56_s17 = sshll.u32 %s1151_s16, 4  ;;  %s1152_s21 = smov 64   ;;  %s57_s17 = int_to_ptr.vmem [resolvable:$true] %s56_s17 }
   0xb   :  { %s1153_s22 = smov 4   ;;  %s1154_s23 = smov [#allocation10]  }
   0xc   :  { %62 = dma.hbm_to_vmem [thread:$0]  %s55_s15, 1024, %s57_s17, [#allocation8], %s1152_s21, %s1152_s21, %s1153_s22  }
   0xd   :  { %s82_s24 = sshll.u32 %s1154_s23, 4  ;;  %s107_s26 = sshll.u32 %s1306_s6, 4  ;;  %s83_s24 = int_to_ptr.vmem [resolvable:$true] %s82_s24  ;;  %s108_s26 = int_to_ptr.hbm [resolvable:$true] %s107_s26 }
   0xe   :  { %88 = dma.hbm_to_vmem [thread:$0]  %s81_s20, 1024, %s83_s24, [#allocation11], %s1152_s21, %s1152_s21, %s1153_s22  }
   0xf   :  { %s35_s28 = sshll.u32 %s1300_s0, 4  ;;  %s1155_s29 = smov [#allocation13]   ;;  %s36_s28 = int_to_ptr.hbm [resolvable:$true] %s35_s28 }
  0x10   :  { %s109_s30 = sshll.u32 %s1155_s29, 4  ;;  %s1156_s15 = smov [#allocation2]   ;;  %s110_s30 = int_to_ptr.vmem [resolvable:$true] %s109_s30 }
  0x11   :  { %112 = dma.hbm_to_vmem [thread:$0]  %s108_s26, 128, %s110_s30, [#allocation14]  }
  0x12   :  { %38 = dma.hbm_to_smem %s36_s28, 16, %s1156_s15, [#allocation5]  }
  0x13   :  { %s44_s6 = sshll.u32 %s1301_s1, 4  ;;  %s1157_s18 = smov [#allocation6]   ;;  %s45_s6 = int_to_ptr.hbm [resolvable:$true] %s44_s6 }
  0x14   :  { %s46_s19 = sshll.u32 %s1157_s18, 4  ;;  %s67_s24 = sshll.u32 %s1303_s3, 4  ;;  %s47_s19 = int_to_ptr.vmem [resolvable:$true] %s46_s19  ;;  %s68_s24 = int_to_ptr.hbm [resolvable:$true] %s67_s24 }
  0x15   :  { %49 = dma.hbm_to_vmem [thread:$0]  %s45_s6, 64, %s47_s19, [#allocation3]  }
  0x16   :  { %s1158_s0 = smov [#allocation9]   ;;  %s93_s4 = sshll.u32 %s1305_s5, 4  ;;  %s94_s4 = int_to_ptr.hbm [resolvable:$true] %s93_s4 }
  0x17   :  { %s69_s25 = sshll.u32 %s1158_s0, 4  ;;  %s118_s28 = sshll.u32 %s1307_s7, 4  ;;  %s70_s25 = int_to_ptr.vmem [resolvable:$true] %s69_s25  ;;  %s119_s28 = int_to_ptr.hbm [resolvable:$true] %s118_s28 }
  0x18   :  { %75 = dma.hbm_to_vmem [thread:$0]  %s68_s24, 1024, %s70_s25, [#allocation8], %s1152_s21, %s1152_s21, %s1153_s22  }
  0x19   :  { %s1159_s29 = smov [#allocation12]   ;;  %s1160_s30 = smov [#allocation15]  }
  0x1a   :  { %s95_s3 = sshll.u32 %s1159_s29, 4  ;;  %s120_s5 = sshll.u32 %s1160_s30, 4  ;;  %s96_s3 = int_to_ptr.vmem [resolvable:$true] %s95_s3  ;;  %s121_s5 = int_to_ptr.vmem [resolvable:$true] %s120_s5 }
  0x1b   :  { %101 = dma.hbm_to_vmem [thread:$0]  %s94_s4, 1024, %s96_s3, [#allocation11], %s1152_s21, %s1152_s21, %s1153_s22  }
  0x1c   :  { %s129_s17 = sshll.u32 %s1308_s8, 4  ;;  %s1161_s6 = smov [#allocation16]   ;;  %s130_s17 = int_to_ptr.hbm [resolvable:$true] %s129_s17 }
  0x1d   :  { %123 = dma.hbm_to_vmem [thread:$0]  %s119_s28, 128, %s121_s5, [#allocation14]  }
  0x1e   :  { %s131_s18 = sshll.u32 %s1161_s6, 4  ;;  %s132_s18 = int_to_ptr.vmem [resolvable:$true] %s131_s18 }
  0x1f   :  { %134 = dma.hbm_to_vmem [thread:$0]  %s130_s17, 128, %s132_s18, [#allocation17]  }
  0x20   :  { %1131 = dma.done.wait [#allocation5], 16  }
  0x21   :  { %1132 = vsyncadd [#allocation5], 4294967280 }
  0x22   :  { %1133 = dma.done.wait [#allocation3], 64  }
  0x23   :  { %1134 = vsyncadd [#allocation3], 4294967232 }
  0x24   :  { %1135 = dma.done.wait [#allocation8], 2048  }
  0x25   :  { %1136 = vsyncadd [#allocation8], 4294965248 }
  0x26   :  { %1137 = dma.done.wait [#allocation11], 2048  }
  0x27   :  { %1138 = vsyncadd [#allocation11], 4294965248 }
  0x28   :  { %1139 = dma.done.wait [#allocation14], 256  }
  0x29   :  { %1140 = vsyncadd [#allocation14], 4294967040 }
  0x2a   :  { %1141 = dma.done.wait [#allocation17], 128  }
  0x2b   :  { %1142 = vsyncadd [#allocation17], 4294967168 }
  0x2c   :  { %171 = sfence }
  0x2d   :  { %v741_v0 = vld [vmem:[#allocation7 + $0x38] sm:$0xff]  ;;  %v740_v1 = vld [vmem:[#allocation7 + $0x30] sm:$0xff]  ;;  %v739_v6 = vld [vmem:[#allocation7 + $0x28] sm:$0xff]  ;;  %s172_s7 = sld [smem:[#allocation2]]  ;;  %s522_s20 = sshll.u32 %s1310_s10, 4  ;;  %s523_s20 = int_to_ptr.hbm [resolvable:$true] %s522_s20 }
  0x2e   :  { %240 = vmatpush.bf16.msra.mxu0 %v741_v0  ;;  %v749_v2 = vld [vmem:[#allocation9 + $0x38] sm:$0xff]  ;;  %v748_v4 = vld [vmem:[#allocation9 + $0x30] sm:$0xff]  ;;  %v747_v7 = vld [vmem:[#allocation9 + $0x28] sm:$0xff]  ;;  %s604_s8 = sld [smem:[#allocation2 + $0x1]]  ;;  %s1162_s23 = smov [#allocation19]  }
  0x2f   :  { %v765_v3 = vld [vmem:[#allocation12 + $0x38] sm:$0xff]  ;;  %322 = vmatpush.bf16.msra.mxu1 %v749_v2  ;;  %v764_v5 = vld [vmem:[#allocation12 + $0x30] sm:$0xff]  ;;  %v763_v8 = vld [vmem:[#allocation12 + $0x28] sm:$0xff]  ;;  %s605_s21 = sld [smem:[#allocation2 + $0x2]]  ;;  %s520_s24 = sshll.u32 %s1162_s23, 4  ;;  %s521_s24 = int_to_ptr.vmem [resolvable:$true] %s520_s24 }
  0x30   :  { %481 = vmatpush.bf16.msra.mxu3 %v765_v3  ;;  %v738_v9 = vld [vmem:[#allocation7 + $0x20] sm:$0xff]  ;;  %v737_v12 = vld [vmem:[#allocation7 + $0x18] sm:$0xff]  ;;  %v736_v15 = vld [vmem:[#allocation7 + $0x10] sm:$0xff]  ;;  %s1163_s0 = smov [#allocation22]   ;;  %s544_s4 = sshll.u32 %s1312_s12, 4  ;;  %s545_s4 = int_to_ptr.hbm [resolvable:$true] %s544_s4 }
  0x31   :  { %v746_v10 = vld [vmem:[#allocation9 + $0x20] sm:$0xff]  ;;  %v745_v13 = vld [vmem:[#allocation9 + $0x18] sm:$0xff]  ;;  %v744_v16 = vld [vmem:[#allocation9 + $0x10] sm:$0xff]  ;;  %s542_s25 = sshll.u32 %s1163_s0, 4  ;;  %s511_s28 = sshll.u32 %s1309_s9, 4  ;;  %s543_s25 = int_to_ptr.vmem [resolvable:$true] %s542_s25  ;;  %s512_s28 = int_to_ptr.hbm [resolvable:$true] %s511_s28 }
  0x32   :  { %241 = vmatpush.bf16.msra.mxu0 %v740_v1  ;;  %v762_v11 = vld [vmem:[#allocation12 + $0x20] sm:$0xff]  ;;  %v761_v14 = vld [vmem:[#allocation12 + $0x18] sm:$0xff]  ;;  %v760_v17 = vld [vmem:[#allocation12 + $0x10] sm:$0xff]  ;;  %s1164_s10 = smov [#allocation18]   ;;  %s1165_s3 = smov [#allocation21]  }
  0x33   :  { %323 = vmatpush.bf16.msra.mxu1 %v748_v4  ;;  %v735_v18 = vld [vmem:[#allocation7 + $0x8] sm:$0xff]  ;;  %v734_v21 = vld [vmem:[#allocation7] sm:$0xff]  ;;  %v175_v22 = vld [vmem:[#allocation6] sm:$0xf]  ;;  %v254_v31 = vstv %s172_s7  ;;  %s509_s29 = sshll.u32 %s1164_s10, 4  ;;  %s531_s30 = sshll.u32 %s1165_s3, 4  ;;  %s510_s29 = int_to_ptr.vmem [resolvable:$true] %s509_s29  ;;  %s532_s30 = int_to_ptr.vmem [resolvable:$true] %s531_s30 }
  0x34   :  { %482 = vmatpush.bf16.msra.mxu3 %v764_v5  ;;  %v743_v19 = vld [vmem:[#allocation9 + $0x8] sm:$0xff]  ;;  %v742_v23 = vld [vmem:[#allocation9] sm:$0xff]  ;;  %v757_v25 = vld [vmem:[#allocation10 + $0x38] sm:$0xff]  ;;  %v336_v41 = vstv %s604_s8  ;;  %s533_s16 = sshll.u32 %s1311_s11, 4  ;;  %s1166_s12 = smov [#allocation25]   ;;  %s534_s16 = int_to_ptr.hbm [resolvable:$true] %s533_s16 }
  0x35   :  { %v759_v20 = vld [vmem:[#allocation12 + $0x8] sm:$0xff]  ;;  %v758_v24 = vld [vmem:[#allocation12] sm:$0xff]  ;;  %404 = vmatpush.bf16.msra.mxu2 %v757_v25  ;;  %v756_v26 = vld [vmem:[#allocation10 + $0x30] sm:$0xff]  ;;  %v495_v45 = vstv %s605_s21  ;;  %s564_s17 = sshll.u32 %s1166_s12, 4  ;;  %s566_s9 = sshll.u32 %s1314_s14, 4  ;;  %s565_s17 = int_to_ptr.vmem [resolvable:$true] %s564_s17  ;;  %s567_s9 = int_to_ptr.hbm [resolvable:$true] %s566_s9 }
  0x36   :  { %242 = vmatpush.bf16.msra.mxu0 %v739_v6  ;;  %v755_v27 = vld [vmem:[#allocation10 + $0x28] sm:$0xff]  ;;  %v754_v28 = vld [vmem:[#allocation10 + $0x20] sm:$0xff]  ;;  %v753_v29 = vld [vmem:[#allocation10 + $0x18] sm:$0xff]  ;;  %s1167_s7 = smov [#allocation24]   ;;  %s555_s19 = sshll.u32 %s1313_s13, 4  ;;  %s556_s19 = int_to_ptr.hbm [resolvable:$true] %s555_s19 }
  0x37   :  { %324 = vmatpush.bf16.msra.mxu1 %v747_v7  ;;  %v253_v30 = vld [vmem:[#allocation13] sm:$0xff]  ;;  %v752_v32 = vld [vmem:[#allocation10 + $0x10] sm:$0xff]  ;;  %v751_v34 = vld [vmem:[#allocation10 + $0x8] sm:$0xff]  ;;  %s553_s8 = sshll.u32 %s1167_s7, 4  ;;  %s554_s8 = int_to_ptr.vmem [resolvable:$true] %s553_s8 }
  0x38   :  { %483 = vmatpush.bf16.msra.mxu3 %v763_v8  ;;  %v255_v33 = vmul.f32 %v254_v31, %v253_v30  ;;  %v750_v39 = vld [vmem:[#allocation10] sm:$0xff]  ;;  %v335_v40 = vld [vmem:[#allocation15] sm:$0xff]  ;;  %v494_v44 = vld [vmem:[#allocation16] sm:$0xff] }
  0x39   :  { %405 = vmatpush.bf16.msra.mxu2 %v756_v26  ;;  %v337_v42 = vmul.f32 %v336_v41, %v335_v40  ;;  %v496_v48 = vmul.f32 %v495_v45, %v494_v44 }
  0x3a   :  { %243 = vmatpush.bf16.msra.mxu0 %v738_v9 }
  0x3b   :  { %325 = vmatpush.bf16.msra.mxu1 %v746_v10 }
  0x3c   :  { %484 = vmatpush.bf16.msra.mxu3 %v762_v11 }
  0x3d   :  { %406 = vmatpush.bf16.msra.mxu2 %v755_v27 }
  0x3e   :  { %244 = vmatpush.bf16.msra.mxu0 %v737_v12 }
  0x3f   :  { %326 = vmatpush.bf16.msra.mxu1 %v745_v13 }
  0x40   :  { %485 = vmatpush.bf16.msra.mxu3 %v761_v14 }
  0x41   :  { %407 = vmatpush.bf16.msra.mxu2 %v754_v28 }
  0x42   :  { %245 = vmatpush.bf16.msra.mxu0 %v736_v15 }
  0x43   :  { %327 = vmatpush.bf16.msra.mxu1 %v744_v16 }
  0x44   :  { %486 = vmatpush.bf16.msra.mxu3 %v760_v17 }
  0x45   :  { %408 = vmatpush.bf16.msra.mxu2 %v753_v29 }
  0x46   :  { %246 = vmatpush.bf16.msra.mxu0 %v735_v18 }
  0x47   :  { %328 = vmatpush.bf16.msra.mxu1 %v743_v19 }
  0x48   :  { %487 = vmatpush.bf16.msra.mxu3 %v759_v20 }
  0x49   :  { %409 = vmatpush.bf16.msra.mxu2 %v752_v32 }
  0x4a   :  { %247 = vmatpush.bf16.msra.mxu0 %v734_v21 }
  0x4b   :  { %329 = vmatpush.bf16.msra.mxu1 %v742_v23 }
  0x4c   :  { %488 = vmatpush.bf16.msra.mxu3 %v758_v24 }
  0x4d   :  { %248 = vmatmul.bf16.vlgmr.msra.gmra.mxu0 %v175_v22  ;;  %410 = vmatpush.bf16.msra.mxu2 %v751_v34 }
  0x51   :  { %411 = vmatpush.bf16.msra.mxu2 %v750_v39 }
  0xca   :  { %v249_v35 = vpop.f32.mrf.mxu0 }
  0xcb   :  { %v256_v36 = vadd.f32 %v255_v33, %v249_v35  ;;  %499 = vst [vmem:[#allocation19] sm:$0xff] %v249_v35 }
  0xcc   :  { %525 = dma.vmem_to_hbm [thread:$0]  %s521_s24, 128, %s523_s20, [#allocation20]  }
  0xcd   :  { %500 = vst [vmem:[#allocation21] sm:$0xff] %v256_v36  ;;  %v257_v37 = vpack.c.bf16 %v256_v36, %v256_v36 }
  0xce   :  { %536 = dma.vmem_to_hbm [thread:$0]  %s532_s30, 128, %s534_s16, [#allocation20]  }
  0xcf   :  { %330 = vmatmul.bf16.vlgmr.msra.gmra.mxu1 %v257_v37  ;;  %489 = vmatmul.bf16.vlgmr.msra.gmra.mxu3 %v257_v37 }
  0xd2   :  { %v251_v38 = vpop.f32.mrf.mxu0 }
 0x14c   :  { %v331_v43 = vpop.f32.mrf.mxu1 }
 0x14d   :  { %v338_v46 = vadd.f32 %v337_v42, %v331_v43  ;;  %501 = vst [vmem:[#allocation22] sm:$0xff] %v331_v43 }
 0x14e   :  { %547 = dma.vmem_to_hbm [thread:$0]  %s543_s25, 128, %s545_s4, [#allocation23]  }
 0x14f   :  { %v339_v47 = vpack.c.bf16 %v338_v46, %v338_v46 }
 0x151   :  { %412 = vmatmul.bf16.vlgmr.msra.gmra.mxu2 %v339_v47 }
 0x152   :  { %v490_v49 = vpop.f32.mrf.mxu3 }
 0x153   :  { %v497_v50 = vadd.f32 %v496_v48, %v490_v49  ;;  %503 = vst [vmem:[#allocation25] sm:$0xff] %v490_v49 }
 0x154   :  { %v333_v51 = vpop.f32.mrf.mxu1  ;;  %569 = dma.vmem_to_hbm [thread:$0]  %s565_s17, 128, %s567_s9, [#allocation26]  }
 0x155   :  { %498 = vst [vmem:[#allocation18] sm:$0xff] %v497_v50 }
 0x156   :  { %514 = dma.vmem_to_hbm [thread:$0]  %s510_s29, 128, %s512_s28, [#allocation4]  }
 0x15a   :  { %v492_v52 = vpop.f32.mrf.mxu3 }
 0x1d4   :  { %v413_v53 = vpop.f32.mrf.mxu2 }
 0x1d5   :  { %502 = vst [vmem:[#allocation24] sm:$0xff] %v413_v53 }
 0x1d6   :  { %558 = dma.vmem_to_hbm [thread:$0]  %s554_s8, 128, %s556_s19, [#allocation23]  }
 0x1dc   :  { %v415_v54 = vpop.f32.mrf.mxu2 }
 0x1dd   :  { %1143 = dma.done.wait [#allocation4], 128  }
 0x1de   :  { %1144 = vsyncadd [#allocation4], 4294967168 }
 0x1df   :  { %1145 = dma.done.wait [#allocation20], 256  }
 0x1e0   :  { %1146 = vsyncadd [#allocation20], 4294967040 }
 0x1e1   :  { %1147 = dma.done.wait [#allocation23], 256  }
 0x1e2   :  { %1148 = vsyncadd [#allocation23], 4294967040 }
 0x1e3   :  { %1149 = dma.done.wait [#allocation26], 128  }
 0x1e4   :  { %1150 = vsyncadd [#allocation26], 4294967168 }
 0x1e5   :  { %594 = vsyncpa [#allocation3], 1 }
 0x1e6   :  { %595 = vsyncpa [#allocation8], 1 }
 0x1e7   :  { %596 = vsyncpa [#allocation11], 1 }
 0x1e8   :  { %597 = vsyncpa [#allocation14], 1 }
 0x1e9   :  { %598 = vsyncpa [#allocation17], 1 }
 0x1ea   :  { %599 = vsyncpa [#allocation4], 1 }
 0x1eb   :  { %600 = vsyncpa [#allocation20], 1 }
 0x1ec   :  { %601 = vsyncpa [#allocation23], 1 }
 0x1ed   :  { %602 = vsyncpa [#allocation26], 1 }
 0x1ee   :  { %603 = vsyncpa [#allocation5], 1 }

</bundles_post_ra>
